<compile_context>
chip_gen: v6e
topology: v6e:2x2x1
jax: 0.10.0
libtpu: 0.0.40
codegen_flags: <defaults>
</compile_context>

<pallas_src>
import functools

import jax
import jax.numpy as jnp
from jax.experimental import pallas as pl
from jax.experimental.pallas import tpu as pltpu


def _mha_kernel(num_head, head_dim, compute_dtype,
                x_ref, mask_ref,
                wqkv_ref, bqkv_ref, wfc_ref, bfc_ref, gamma_ref, beta_ref,
                out_ref):
    nh, hd = num_head, head_dim
    _, Bt, S, E = x_ref.shape
    H = nh * hd
    M = Bt * S
    cd = compute_dtype

    # ---- fused Q/K/V projection: one batched MXU dot at full H lane width --
    # No nh-fold replication of the activations; leading-dim merge is free.
    x = x_ref[...].reshape(3, M, E)
    qkv = jax.lax.dot_general(
        x.astype(cd), wqkv_ref[...].astype(cd),
        dimension_numbers=(((2,), (1,)), ((0,), (0,))),
        preferred_element_type=jnp.float32)                    # (3, M, H) f32
    qkv = qkv + bqkv_ref[...]                                  # (3, 1, H)
    # NOTE: 1/sqrt(hd) is already folded into Wq / bq by the wrapper.

    # ---- split heads: static lane slices, head-major on a leading axis -----
    def heads(t):                                              # -> (nh*Bt, S, hd)
        Xb = qkv[t].reshape(Bt, S, H)
        return jnp.concatenate(
            [Xb[None, :, :, h * hd:(h + 1) * hd] for h in range(nh)],
            axis=0).reshape(nh * Bt, S, hd)

    Qh, Kh, Vh = heads(0), heads(1), heads(2)

    # ---- scaled dot-product attention, batched over (head, batch) ----------
    scores = jnp.einsum("nqd,nkd->nqk", Qh.astype(cd), Kh.astype(cd),
                        preferred_element_type=jnp.float32)    # (nh*Bt, S, S)

    # Additive mask: finite large-negative (not -inf) so fully-masked rows
    # do not generate NaNs.  mask is int8 (0/1), 1 = masked out; broadcast
    # across heads on the leading axis.
    maskbias = mask_ref[...].astype(jnp.float32) * jnp.float32(-1e30)  # (Bt,S,S)
    scores = (scores.reshape(nh, Bt, S, S) + maskbias[None]).reshape(nh * Bt, S, S)

    # Softmax over the key axis (PyTorch Softmax(dim=2)).  The normalization
    # by 1/denom is applied AFTER the p@V matmul (S*hd elements, not S*S).
    m = jnp.max(scores, axis=-1, keepdims=True)
    e = jnp.exp(scores - m)
    denom = jnp.sum(e, axis=-1, keepdims=True)                 # (nh*Bt, S, 1)
    # TODO(synk): training-mode dropout on attention weights not implemented.

    ctx = jnp.einsum("nqk,nkd->nqd", e.astype(cd), Vh.astype(cd),
                     preferred_element_type=jnp.float32)       # (nh*Bt, S, hd)
    ctx = ctx * pl.reciprocal(denom, approx=True)              # EUP reciprocal

    # ---- output projection: per-head (M,hd)x(hd,E), accumulated into one
    # (M, E) value (no (nh, M, E) intermediate, no leading-axis reduction) ---
    ctx_h = ctx.reshape(nh, M, hd)                             # leading reshape
    wfc = wfc_ref[...].astype(cd)                              # (nh, hd, E)
    o = None
    for h in range(nh):                                        # nh is static & small
        oh = jnp.dot(ctx_h[h].astype(cd), wfc[h],
                     preferred_element_type=jnp.float32)       # (M, E)
        o = oh if o is None else o + oh
    o = o + bfc_ref[...]

    # Residual: re-read from the (still VMEM-resident) input block so the
    # value does not stay live across both attention matmuls.
    y = o + x_ref[0].reshape(M, E)

    # ---- LayerNorm over the feature dim (eps = 1e-5, f32 math) -------------
    mu = jnp.mean(y, axis=-1, keepdims=True)
    var = jnp.mean((y - mu) ** 2, axis=-1, keepdims=True)
    y_norm = (y - mu) * jax.lax.rsqrt(var + 1e-5)
    out = y_norm * gamma_ref[...] + beta_ref[...]
    out_ref[...] = out.reshape(Bt, S, E).astype(out_ref.dtype)


def multi_head_attention(q, k, v, mask, params, *, num_head,
                         batch_block=1, compute_dtype=jnp.bfloat16,
                         vmem_limit_bytes=None):
    """q, k, v: [B, S, E] float32.  mask: [B, S, S] (True/nonzero = masked).

    batch_block: batch elements per grid step (keep >= 2 grid steps so v7x can
    shard the "parallel" batch axis across both TensorCores; halve the v6e
    setting on v7x since its VMEM is half the size).
    compute_dtype: MXU input dtype.  bfloat16 (default) is MXU-native on
    v5e/v6e/v7x; accumulation and softmax math stay float32.  Pass
    jnp.float32 for bitwise-tighter results.
    """
    B, S, E = q.shape
    H = params["wq"].shape[1]
    nh = num_head
    hd = H // nh
    Bt = batch_block
    assert B % Bt == 0, "batch_block must divide batch size"

    # Pack q/k/v into one input stream; q doubles as the residual in-kernel.
    xqkv = jnp.stack([q, k, v], axis=0)                        # (3, B, S, E)
    mask_i8 = (mask != 0).astype(jnp.int8)                     # 1 = masked

    # Fold 1/sqrt(hd) into Wq / bq (one-time, outside the kernel).
    inv_scale = jnp.float32(1.0 / (hd ** 0.5))
    wqkv = jnp.stack([params["wq"] * inv_scale, params["wk"], params["wv"]],
                     axis=0)                                   # (3, E, H)
    bqkv = jnp.stack([params["bq"] * inv_scale, params["bk"], params["bv"]],
                     axis=0).reshape(3, 1, H)                  # (3, 1, H)
    wfc_h = params["wfc"].reshape(nh, hd, E)                   # (nh, hd, E)
    bfc = params["bfc"].reshape(1, E)
    gamma = params["gamma"].reshape(1, E)
    beta = params["beta"].reshape(1, E)

    kernel = functools.partial(_mha_kernel, nh, hd, compute_dtype)

    # Per-step working-set estimate -> scoped VMEM limit (generous margin,
    # clamped to 64 MiB so it remains valid on v7x's smaller physical VMEM).
    M = Bt * S
    io_bytes = 2 * (3 * Bt * S * E * 4 + Bt * S * S + Bt * S * E * 4)
    w_bytes = 2 * 4 * (3 * E * H + 3 * H + H * E + 3 * E)
    inter_bytes = 4 * (3 * M * H + 3 * nh * M * hd + 3 * nh * Bt * S * S
                       + nh * M * hd + 3 * M * E)
    if vmem_limit_bytes is None:
        vmem_limit_bytes = int(min(64 << 20,
                                   max(16 << 20,
                                       io_bytes + w_bytes + 3 * inter_bytes)))

    flops = 2 * B * S * H * (4 * E + 2 * S)
    transcendentals = B * nh * S * S
    bytes_accessed = (4 * 3 * B * S * E + B * S * S
                      + 4 * (3 * E * H + 3 * H + H * E + 3 * E)
                      + 4 * B * S * E)

    full3 = lambda b: (0, 0, 0)

    return pl.pallas_call(
        kernel,
        out_shape=jax.ShapeDtypeStruct((B, S, E), jnp.float32),
        grid_spec=pltpu.PrefetchScalarGridSpec(
            num_scalar_prefetch=0,
            grid=(B // Bt,),
            in_specs=[
                pl.BlockSpec((3, Bt, S, E), lambda b: (0, b, 0, 0)),   # q|k|v
                pl.BlockSpec((Bt, S, S), lambda b: (b, 0, 0)),         # mask i8
                pl.BlockSpec((3, E, H), full3),                        # Wq|Wk|Wv
                pl.BlockSpec((3, 1, H), full3),                        # bq|bk|bv
                pl.BlockSpec((nh, hd, E), full3),                      # Wfc (head-major)
                pl.BlockSpec((1, E), lambda b: (0, 0)),                # bfc
                pl.BlockSpec((1, E), lambda b: (0, 0)),                # gamma
                pl.BlockSpec((1, E), lambda b: (0, 0)),                # beta
            ],
            out_specs=pl.BlockSpec((Bt, S, E), lambda b: (b, 0, 0)),
        ),
        compiler_params=pltpu.CompilerParams(
            dimension_semantics=("parallel",),
            vmem_limit_bytes=vmem_limit_bytes),
        cost_estimate=pl.CostEstimate(
            flops=flops, transcendentals=transcendentals,
            bytes_accessed=bytes_accessed),
    )(xqkv, mask_i8, wqkv, bqkv, wfc_h, bfc, gamma, beta)


def _reference(q, k, v, mask, params, *, num_head):
    """Plain-JAX reference mirroring the PyTorch forward (eval mode)."""
    B, S, E = q.shape
    H = params["wq"].shape[1]
    hd = H // num_head
    Q = q @ params["wq"] + params["bq"]
    K = k @ params["wk"] + params["bk"]
    V = v @ params["wv"] + params["bv"]
    rs = lambda X: X.reshape(B, S, num_head, hd).transpose(0, 2, 1, 3)
    Q, K, V = rs(Q), rs(K), rs(V)
    a = jnp.einsum("bhqd,bhkd->bhqk", Q, K) / jnp.sqrt(jnp.float32(hd))
    a = jnp.where(mask[:, None, :, :], -jnp.inf, a)
    a = jax.nn.softmax(a, axis=-1)
    o = jnp.einsum("bhqk,bhkd->bhqd", a, V)
    o = o.transpose(0, 2, 1, 3).reshape(B, S, H)
    o = o @ params["wfc"] + params["bfc"]
    y = o + q
    mu = jnp.mean(y, axis=-1, keepdims=True)
    var = jnp.mean((y - mu) ** 2, axis=-1, keepdims=True)
    return (y - mu) * jax.lax.rsqrt(var + 1e-5) * params["gamma"] + params["beta"]


if __name__ == "__main__":
    B, S, E = 2, 8, 32       # batch, seq_len, emb_dim
    NUM_HEAD = 2
    H = 32                   # h_dim

    key = jax.random.PRNGKey(0)
    keys = jax.random.split(key, 12)

    params = {
        "wq":  0.1 * jax.random.normal(keys[0], (E, H), jnp.float32),
        "bq":  0.1 * jax.random.normal(keys[1], (H,), jnp.float32),
        "wk":  0.1 * jax.random.normal(keys[2], (E, H), jnp.float32),
        "bk":  0.1 * jax.random.normal(keys[3], (H,), jnp.float32),
        "wv":  0.1 * jax.random.normal(keys[4], (E, H), jnp.float32),
        "bv":  0.1 * jax.random.normal(keys[5], (H,), jnp.float32),
        "wfc": 0.1 * jax.random.normal(keys[6], (H, E), jnp.float32),
        "bfc": 0.1 * jax.random.normal(keys[7], (E,), jnp.float32),
        "gamma": jnp.ones((E,), jnp.float32),
        "beta":  jnp.zeros((E,), jnp.float32),
    }

    q = jax.random.normal(keys[8], (B, S, E), jnp.float32)
    k = jax.random.normal(keys[9], (B, S, E), jnp.float32)
    v = jax.random.normal(keys[10], (B, S, E), jnp.float32)

    # Padding-style mask: key positions >= length are masked (True = masked).
    lengths = jnp.array([S, S - 2], dtype=jnp.int32)
    key_pad = jnp.arange(S)[None, :] >= lengths[:, None]        # (B, S)
    mask = jnp.broadcast_to(key_pad[:, None, :], (B, S, S))     # (B, S, S)

    ref = _reference(q, k, v, mask, params, num_head=NUM_HEAD)

    # 1) Exactness check with f32 MXU inputs (tolerance covers the EUP
    #    approximate reciprocal in the softmax normalization).
    out_f32 = multi_head_attention(q, k, v, mask, params, num_head=NUM_HEAD,
                                   batch_block=1, compute_dtype=jnp.float32)
    out_f32 = jax.block_until_ready(out_f32)
    assert out_f32.shape == (B, S, E)
    assert jnp.allclose(out_f32, ref, rtol=2e-3, atol=2e-3), "f32 mismatch vs reference"

    # 2) Default (bf16 MXU inputs, f32 accumulation) - perf configuration.
    out_bf16 = multi_head_attention(q, k, v, mask, params, num_head=NUM_HEAD,
                                    batch_block=1)
    out_bf16 = jax.block_until_ready(out_bf16)
    assert out_bf16.shape == (B, S, E)
    assert jnp.allclose(out_bf16, ref, rtol=5e-2, atol=5e-2), "bf16 mismatch vs reference"

    print("KERNEL_OK")
</pallas_src>

<mosaic_0001>
module attributes {stable_mosaic.version = 11 : i64} {
  func.func @_mha_kernel(%arg0: i32, %arg1: memref<3x1x8x32xf32, #tpu.memory_space<vmem>>, %arg2: memref<1x8x8xi8, #tpu.memory_space<vmem>>, %arg3: memref<3x32x32xf32, #tpu.memory_space<vmem>>, %arg4: memref<3x1x32xf32, #tpu.memory_space<vmem>>, %arg5: memref<2x16x32xf32, #tpu.memory_space<vmem>>, %arg6: memref<1x32xf32, #tpu.memory_space<vmem>>, %arg7: memref<1x32xf32, #tpu.memory_space<vmem>>, %arg8: memref<1x32xf32, #tpu.memory_space<vmem>>, %arg9: memref<1x8x32xf32, #tpu.memory_space<vmem>>) attributes {dimension_semantics = [#tpu.dimension_semantics<parallel>], iteration_bounds = array<i64: 2>, scalar_prefetch = 0 : i64, scratch_operands = 0 : i64, tpu.core_type = #tpu.core_type<tc>, window_params = [{transform_indices = @transform_0, window_bounds = array<i64: 3, 1, 8, 32>}, {transform_indices = @transform_1, window_bounds = array<i64: 1, 8, 8>}, {pipeline_mode = #tpu.pipeline_mode<synchronous>, transform_indices = @transform_2, window_bounds = array<i64: 3, 32, 32>}, {pipeline_mode = #tpu.pipeline_mode<synchronous>, transform_indices = @transform_3, window_bounds = array<i64: 3, 1, 32>}, {pipeline_mode = #tpu.pipeline_mode<synchronous>, transform_indices = @transform_4, window_bounds = array<i64: 2, 16, 32>}, {pipeline_mode = #tpu.pipeline_mode<synchronous>, transform_indices = @transform_5, window_bounds = array<i64: 1, 32>}, {pipeline_mode = #tpu.pipeline_mode<synchronous>, transform_indices = @transform_6, window_bounds = array<i64: 1, 32>}, {pipeline_mode = #tpu.pipeline_mode<synchronous>, transform_indices = @transform_7, window_bounds = array<i64: 1, 32>}, {transform_indices = @transform_8, window_bounds = array<i64: 1, 8, 32>}]} {
    %c0 = arith.constant 0 : index
    %c0_0 = arith.constant 0 : index
    %c0_1 = arith.constant 0 : index
    %c0_2 = arith.constant 0 : index
    %0 = vector.load %arg1[%c0, %c0_0, %c0_1, %c0_2] : memref<3x1x8x32xf32, #tpu.memory_space<vmem>>, vector<3x1x8x32xf32>
    %1 = vector.shape_cast %0 : vector<3x1x8x32xf32> to vector<3x8x32xf32>
    %c0_3 = arith.constant 0 : index
    %c0_4 = arith.constant 0 : index
    %c0_5 = arith.constant 0 : index
    %2 = vector.load %arg3[%c0_3, %c0_4, %c0_5] : memref<3x32x32xf32, #tpu.memory_space<vmem>>, vector<3x32x32xf32>
    %cst = arith.constant dense<0.000000e+00> : vector<3x8x32xf32>
    %3 = tpu.matmul %1, %2, %cst {dimension_numbers = #tpu.dot_dimension_numbers<[2], [1], [1], [2], [0, 0, 0, 1, 1, 2], [0], [0]>} : vector<3x8x32xf32>, vector<3x32x32xf32>, vector<3x8x32xf32> -> vector<3x8x32xf32>
    %c0_6 = arith.constant 0 : index
    %c0_7 = arith.constant 0 : index
    %c0_8 = arith.constant 0 : index
    %4 = vector.load %arg4[%c0_6, %c0_7, %c0_8] : memref<3x1x32xf32, #tpu.memory_space<vmem>>, vector<3x1x32xf32>
    %5 = vector.broadcast %4 : vector<3x1x32xf32> to vector<3x8x32xf32>
    %6 = arith.addf %3, %5 : vector<3x8x32xf32>
    %7 = vector.extract_strided_slice %6 {offsets = [0, 0, 0], sizes = [1, 8, 32], strides = [1, 1, 1]} : vector<3x8x32xf32> to vector<1x8x32xf32>
    %8 = vector.shape_cast %7 : vector<1x8x32xf32> to vector<8x32xf32>
    %9 = vector.shape_cast %8 : vector<8x32xf32> to vector<1x8x32xf32>
    %10 = vector.extract_strided_slice %9 {offsets = [0, 0, 0], sizes = [1, 8, 16], strides = [1, 1, 1]} : vector<1x8x32xf32> to vector<1x8x16xf32>
    %11 = vector.shape_cast %10 : vector<1x8x16xf32> to vector<1x1x8x16xf32>
    %12 = vector.extract_strided_slice %9 {offsets = [0, 0, 16], sizes = [1, 8, 16], strides = [1, 1, 1]} : vector<1x8x32xf32> to vector<1x8x16xf32>
    %13 = vector.shape_cast %12 : vector<1x8x16xf32> to vector<1x1x8x16xf32>
    %14 = tpu.concatenate %11, %13 in 0 : vector<1x1x8x16xf32>, vector<1x1x8x16xf32> -> vector<2x1x8x16xf32>
    %15 = vector.shape_cast %14 : vector<2x1x8x16xf32> to vector<2x8x16xf32>
    %16 = vector.extract_strided_slice %6 {offsets = [1, 0, 0], sizes = [1, 8, 32], strides = [1, 1, 1]} : vector<3x8x32xf32> to vector<1x8x32xf32>
    %17 = vector.shape_cast %16 : vector<1x8x32xf32> to vector<8x32xf32>
    %18 = vector.shape_cast %17 : vector<8x32xf32> to vector<1x8x32xf32>
    %19 = vector.extract_strided_slice %18 {offsets = [0, 0, 0], sizes = [1, 8, 16], strides = [1, 1, 1]} : vector<1x8x32xf32> to vector<1x8x16xf32>
    %20 = vector.shape_cast %19 : vector<1x8x16xf32> to vector<1x1x8x16xf32>
    %21 = vector.extract_strided_slice %18 {offsets = [0, 0, 16], sizes = [1, 8, 16], strides = [1, 1, 1]} : vector<1x8x32xf32> to vector<1x8x16xf32>
    %22 = vector.shape_cast %21 : vector<1x8x16xf32> to vector<1x1x8x16xf32>
    %23 = tpu.concatenate %20, %22 in 0 : vector<1x1x8x16xf32>, vector<1x1x8x16xf32> -> vector<2x1x8x16xf32>
    %24 = vector.shape_cast %23 : vector<2x1x8x16xf32> to vector<2x8x16xf32>
    %25 = vector.extract_strided_slice %6 {offsets = [2, 0, 0], sizes = [1, 8, 32], strides = [1, 1, 1]} : vector<3x8x32xf32> to vector<1x8x32xf32>
    %26 = vector.shape_cast %25 : vector<1x8x32xf32> to vector<8x32xf32>
    %27 = vector.shape_cast %26 : vector<8x32xf32> to vector<1x8x32xf32>
    %28 = vector.extract_strided_slice %27 {offsets = [0, 0, 0], sizes = [1, 8, 16], strides = [1, 1, 1]} : vector<1x8x32xf32> to vector<1x8x16xf32>
    %29 = vector.shape_cast %28 : vector<1x8x16xf32> to vector<1x1x8x16xf32>
    %30 = vector.extract_strided_slice %27 {offsets = [0, 0, 16], sizes = [1, 8, 16], strides = [1, 1, 1]} : vector<1x8x32xf32> to vector<1x8x16xf32>
    %31 = vector.shape_cast %30 : vector<1x8x16xf32> to vector<1x1x8x16xf32>
    %32 = tpu.concatenate %29, %31 in 0 : vector<1x1x8x16xf32>, vector<1x1x8x16xf32> -> vector<2x1x8x16xf32>
    %33 = vector.shape_cast %32 : vector<2x1x8x16xf32> to vector<2x8x16xf32>
    "tpu.trace_start"() <{level = 10 : i32, message = "nqd,nkd->nqk"}> : () -> ()
    %cst_9 = arith.constant dense<0.000000e+00> : vector<2x8x8xf32>
    %34 = tpu.matmul %15, %24, %cst_9 {dimension_numbers = #tpu.dot_dimension_numbers<[2], [2], [1], [1], [0, 0, 0, 1, 1, 1], [0], [0]>} : vector<2x8x16xf32>, vector<2x8x16xf32>, vector<2x8x8xf32> -> vector<2x8x8xf32>
    "tpu.trace_stop"() : () -> ()
    %c0_10 = arith.constant 0 : index
    %c0_11 = arith.constant 0 : index
    %c0_12 = arith.constant 0 : index
    %35 = vector.load %arg2[%c0_10, %c0_11, %c0_12] : memref<1x8x8xi8, #tpu.memory_space<vmem>>, vector<1x8x8xi8>
    %36 = arith.sitofp %35 : vector<1x8x8xi8> to vector<1x8x8xf32>
    %cst_13 = arith.constant -1.000000e+30 : f32
    %37 = vector.broadcast %cst_13 : f32 to vector<1x8x8xf32>
    %38 = arith.mulf %36, %37 : vector<1x8x8xf32>
    %39 = vector.shape_cast %34 : vector<2x8x8xf32> to vector<2x1x8x8xf32>
    %40 = vector.shape_cast %38 : vector<1x8x8xf32> to vector<1x1x8x8xf32>
    %41 = vector.broadcast %40 : vector<1x1x8x8xf32> to vector<2x1x8x8xf32>
    %42 = arith.addf %39, %41 : vector<2x1x8x8xf32>
    %43 = vector.shape_cast %42 : vector<2x1x8x8xf32> to vector<2x8x8xf32>
    %cst_14 = arith.constant dense<0xFF800000> : vector<2x8xf32>
    %44 = vector.multi_reduction <maximumf>, %43, %cst_14 [2] : vector<2x8x8xf32> to vector<2x8xf32>
    %45 = vector.shape_cast %44 : vector<2x8xf32> to vector<2x8x1xf32>
    %46 = vector.broadcast %45 : vector<2x8x1xf32> to vector<2x8x8xf32>
    %47 = arith.subf %43, %46 : vector<2x8x8xf32>
    %48 = math.exp %47 : vector<2x8x8xf32>
    %cst_15 = arith.constant dense<0.000000e+00> : vector<2x8xf32>
    %49 = vector.multi_reduction <add>, %48, %cst_15 [2] : vector<2x8x8xf32> to vector<2x8xf32>
    %50 = vector.shape_cast %49 : vector<2x8xf32> to vector<2x8x1xf32>
    "tpu.trace_start"() <{level = 10 : i32, message = "nqk,nkd->nqd"}> : () -> ()
    %cst_16 = arith.constant dense<0.000000e+00> : vector<2x8x16xf32>
    %51 = tpu.matmul %48, %33, %cst_16 {dimension_numbers = #tpu.dot_dimension_numbers<[2], [1], [1], [2], [0, 0, 0, 1, 1, 2], [0], [0]>} : vector<2x8x8xf32>, vector<2x8x16xf32>, vector<2x8x16xf32> -> vector<2x8x16xf32>
    "tpu.trace_stop"() : () -> ()
    %52 = tpu.reciprocal %50 {approx = true} : vector<2x8x1xf32> -> vector<2x8x1xf32>
    %53 = vector.broadcast %52 : vector<2x8x1xf32> to vector<2x8x16xf32>
    %54 = arith.mulf %51, %53 : vector<2x8x16xf32>
    %c0_17 = arith.constant 0 : index
    %c0_18 = arith.constant 0 : index
    %c0_19 = arith.constant 0 : index
    %55 = vector.load %arg5[%c0_17, %c0_18, %c0_19] : memref<2x16x32xf32, #tpu.memory_space<vmem>>, vector<2x16x32xf32>
    %56 = vector.extract_strided_slice %54 {offsets = [0, 0, 0], sizes = [1, 8, 16], strides = [1, 1, 1]} : vector<2x8x16xf32> to vector<1x8x16xf32>
    %57 = vector.shape_cast %56 : vector<1x8x16xf32> to vector<8x16xf32>
    %58 = vector.extract_strided_slice %55 {offsets = [0, 0, 0], sizes = [1, 16, 32], strides = [1, 1, 1]} : vector<2x16x32xf32> to vector<1x16x32xf32>
    %59 = vector.shape_cast %58 : vector<1x16x32xf32> to vector<16x32xf32>
    %cst_20 = arith.constant dense<0.000000e+00> : vector<8x32xf32>
    %60 = tpu.matmul %57, %59, %cst_20 {dimension_numbers = #tpu.dot_dimension_numbers<[1], [0], [0], [1], [0, 0, 1, 1], [], []>} : vector<8x16xf32>, vector<16x32xf32>, vector<8x32xf32> -> vector<8x32xf32>
    %61 = vector.extract_strided_slice %54 {offsets = [1, 0, 0], sizes = [1, 8, 16], strides = [1, 1, 1]} : vector<2x8x16xf32> to vector<1x8x16xf32>
    %62 = vector.shape_cast %61 : vector<1x8x16xf32> to vector<8x16xf32>
    %63 = vector.extract_strided_slice %55 {offsets = [1, 0, 0], sizes = [1, 16, 32], strides = [1, 1, 1]} : vector<2x16x32xf32> to vector<1x16x32xf32>
    %64 = vector.shape_cast %63 : vector<1x16x32xf32> to vector<16x32xf32>
    %cst_21 = arith.constant dense<0.000000e+00> : vector<8x32xf32>
    %65 = tpu.matmul %62, %64, %cst_21 {dimension_numbers = #tpu.dot_dimension_numbers<[1], [0], [0], [1], [0, 0, 1, 1], [], []>} : vector<8x16xf32>, vector<16x32xf32>, vector<8x32xf32> -> vector<8x32xf32>
    %66 = arith.addf %60, %65 : vector<8x32xf32>
    %c0_22 = arith.constant 0 : index
    %c0_23 = arith.constant 0 : index
    %67 = vector.load %arg6[%c0_22, %c0_23] : memref<1x32xf32, #tpu.memory_space<vmem>>, vector<1x32xf32>
    %68 = vector.broadcast %67 : vector<1x32xf32> to vector<8x32xf32>
    %69 = arith.addf %66, %68 : vector<8x32xf32>
    %c0_24 = arith.constant 0 : index
    %c0_25 = arith.constant 0 : index
    %c0_26 = arith.constant 0 : index
    %c0_27 = arith.constant 0 : index
    %70 = vector.load %arg1[%c0_24, %c0_25, %c0_26, %c0_27] : memref<3x1x8x32xf32, #tpu.memory_space<vmem>>, vector<1x1x8x32xf32>
    %71 = vector.shape_cast %70 : vector<1x1x8x32xf32> to vector<1x8x32xf32>
    %72 = vector.shape_cast %71 : vector<1x8x32xf32> to vector<8x32xf32>
    %73 = arith.addf %69, %72 : vector<8x32xf32>
    %cst_28 = arith.constant dense<0.000000e+00> : vector<8xf32>
    %74 = vector.multi_reduction <add>, %73, %cst_28 [1] : vector<8x32xf32> to vector<8xf32>
    %75 = vector.shape_cast %74 : vector<8xf32> to vector<8x1xf32>
    %cst_29 = arith.constant 3.200000e+01 : f32
    %76 = vector.broadcast %cst_29 : f32 to vector<8x1xf32>
    %77 = arith.divf %75, %76 : vector<8x1xf32>
    %78 = vector.broadcast %77 : vector<8x1xf32> to vector<8x32xf32>
    %79 = arith.subf %73, %78 : vector<8x32xf32>
    %80 = arith.mulf %79, %79 : vector<8x32xf32>
    %cst_30 = arith.constant dense<0.000000e+00> : vector<8xf32>
    %81 = vector.multi_reduction <add>, %80, %cst_30 [1] : vector<8x32xf32> to vector<8xf32>
    %82 = vector.shape_cast %81 : vector<8xf32> to vector<8x1xf32>
    %cst_31 = arith.constant 3.200000e+01 : f32
    %83 = vector.broadcast %cst_31 : f32 to vector<8x1xf32>
    %84 = arith.divf %82, %83 : vector<8x1xf32>
    %85 = vector.broadcast %77 : vector<8x1xf32> to vector<8x32xf32>
    %86 = arith.subf %73, %85 : vector<8x32xf32>
    %cst_32 = arith.constant 9.99999974E-6 : f32
    %87 = vector.broadcast %cst_32 : f32 to vector<8x1xf32>
    %88 = arith.addf %84, %87 : vector<8x1xf32>
    %89 = math.rsqrt %88 : vector<8x1xf32>
    %90 = vector.broadcast %89 : vector<8x1xf32> to vector<8x32xf32>
    %91 = arith.mulf %86, %90 : vector<8x32xf32>
    %c0_33 = arith.constant 0 : index
    %c0_34 = arith.constant 0 : index
    %92 = vector.load %arg7[%c0_33, %c0_34] : memref<1x32xf32, #tpu.memory_space<vmem>>, vector<1x32xf32>
    %93 = vector.broadcast %92 : vector<1x32xf32> to vector<8x32xf32>
    %94 = arith.mulf %91, %93 : vector<8x32xf32>
    %c0_35 = arith.constant 0 : index
    %c0_36 = arith.constant 0 : index
    %95 = vector.load %arg8[%c0_35, %c0_36] : memref<1x32xf32, #tpu.memory_space<vmem>>, vector<1x32xf32>
    %96 = vector.broadcast %95 : vector<1x32xf32> to vector<8x32xf32>
    %97 = arith.addf %94, %96 : vector<8x32xf32>
    %98 = vector.shape_cast %97 : vector<8x32xf32> to vector<1x8x32xf32>
    %c0_37 = arith.constant 0 : index
    %c0_38 = arith.constant 0 : index
    %c0_39 = arith.constant 0 : index
    %99 = vector.load %arg9[%c0_37, %c0_38, %c0_39] : memref<1x8x32xf32, #tpu.memory_space<vmem>>, vector<1x8x32xf32>
    tpu.vector_store %arg9[%c0_37, %c0_38, %c0_39], %98 {strides = array<i32>} : memref<1x8x32xf32, #tpu.memory_space<vmem>>, vector<1x8x32xf32>,
    return
  }
  func.func @transform_0(%arg0: i32) -> (i32, i32, i32, i32) {
    %c0_i32 = arith.constant 0 : i32
    %c0_i32_0 = arith.constant 0 : i32
    %c0_i32_1 = arith.constant 0 : i32
    %c0_i32_2 = arith.constant 0 : i32
    return %c0_i32, %arg0, %c0_i32_0, %c0_i32_1 : i32, i32, i32, i32
  }
  func.func @transform_1(%arg0: i32) -> (i32, i32, i32) {
    %c0_i32 = arith.constant 0 : i32
    %c0_i32_0 = arith.constant 0 : i32
    %c0_i32_1 = arith.constant 0 : i32
    return %arg0, %c0_i32, %c0_i32_0 : i32, i32, i32
  }
  func.func @transform_2(%arg0: i32) -> (i32, i32, i32) {
    %c0_i32 = arith.constant 0 : i32
    %c0_i32_0 = arith.constant 0 : i32
    %c0_i32_1 = arith.constant 0 : i32
    %c0_i32_2 = arith.constant 0 : i32
    return %c0_i32, %c0_i32_0, %c0_i32_1 : i32, i32, i32
  }
  func.func @transform_3(%arg0: i32) -> (i32, i32, i32) {
    %c0_i32 = arith.constant 0 : i32
    %c0_i32_0 = arith.constant 0 : i32
    %c0_i32_1 = arith.constant 0 : i32
    %c0_i32_2 = arith.constant 0 : i32
    return %c0_i32, %c0_i32_0, %c0_i32_1 : i32, i32, i32
  }
  func.func @transform_4(%arg0: i32) -> (i32, i32, i32) {
    %c0_i32 = arith.constant 0 : i32
    %c0_i32_0 = arith.constant 0 : i32
    %c0_i32_1 = arith.constant 0 : i32
    %c0_i32_2 = arith.constant 0 : i32
    return %c0_i32, %c0_i32_0, %c0_i32_1 : i32, i32, i32
  }
  func.func @transform_5(%arg0: i32) -> (i32, i32) {
    %c0_i32 = arith.constant 0 : i32
    %c0_i32_0 = arith.constant 0 : i32
    %c0_i32_1 = arith.constant 0 : i32
    return %c0_i32, %c0_i32_0 : i32, i32
  }
  func.func @transform_6(%arg0: i32) -> (i32, i32) {
    %c0_i32 = arith.constant 0 : i32
    %c0_i32_0 = arith.constant 0 : i32
    %c0_i32_1 = arith.constant 0 : i32
    return %c0_i32, %c0_i32_0 : i32, i32
  }
  func.func @transform_7(%arg0: i32) -> (i32, i32) {
    %c0_i32 = arith.constant 0 : i32
    %c0_i32_0 = arith.constant 0 : i32
    %c0_i32_1 = arith.constant 0 : i32
    return %c0_i32, %c0_i32_0 : i32, i32
  }
  func.func @transform_8(%arg0: i32) -> (i32, i32, i32) {
    %c0_i32 = arith.constant 0 : i32
    %c0_i32_0 = arith.constant 0 : i32
    %c0_i32_1 = arith.constant 0 : i32
    return %arg0, %c0_i32, %c0_i32_0 : i32, i32, i32
  }
}

</mosaic_0001>

<bundles_post_ra>
// kernel: tpu_custom_call.1
= control target key start
LH: loop header
LB: loop body
LE: loop exit
PB: predicated region body
PF: predicated region fallthrough
CT: control target
= control target key end

     0   :  { %s2080_s0 = inlined_call_operand.hbm [shape: f32[3,2,8,32], index: 0, kind: input, shape index: {}]   ;;  %s2081_s1 = inlined_call_operand.hbm [shape: s8[2,8,8], index: 1, kind: input, shape index: {}]   ;;  %s2082_s2 = inlined_call_operand.hbm [shape: f32[3,32,32], index: 2, kind: input, shape index: {}]   ;;  %s2083_s3 = inlined_call_operand.vmem [shape: f32[3,1,32], index: 3, kind: input, shape index: {}]   ;;  %s2084_s4 = inlined_call_operand.hbm [shape: f32[2,16,32], index: 4, kind: input, shape index: {}]   ;;  %s2085_s5 = inlined_call_operand.vmem [shape: f32[1,32], index: 5, kind: input, shape index: {}]   ;;  %s2086_s6 = inlined_call_operand.vmem [shape: f32[1,32], index: 6, kind: input, shape index: {}]   ;;  %s2087_s7 = inlined_call_operand.vmem [shape: f32[1,32], index: 7, kind: input, shape index: {}]   ;;  %s2088_s8 = inlined_call_operand.hbm [shape: f32[2,8,32], index: 8, kind: output, shape index: {}]  }
   0x1   :  { %2099 = sst [smem:[#allocation20_spill]] %s2080_s0 }
   0x2   :  { %2100 = sst [smem:[#allocation21_spill]] %s2082_s2 }
   0x3   :  { %2101 = sst [smem:[#allocation22_spill]] %s2084_s4 }
   0x4   :  { %13 = vsyncpa [#allocation3], 0 }
   0x5   :  { %15 = vsyncpa [#allocation3 + $0x1], 0 }
   0x6   :  { %16 = vsyncpa [#allocation6], 0 }
   0x7   :  { %18 = vsyncpa [#allocation6 + $0x1], 0 }
   0x8   :  { %19 = vsyncpa [#allocation9], 0 }
   0x9   :  { %20 = vsyncpa [#allocation4], 0 }
   0xa   :  { %22 = vsyncpa [#allocation4 + $0x1], 0  ;;  %s1758_s27 = smov 0   ;;  %s1760_s28 = smov 0  }
   0xb   :  { %s1762_s29 = smov 0   ;;  %s1764_s30 = smov 0  }
   0xc LB: > { %2102 = sst [smem:[#allocation16_spill]] %s1696_s29  ;;  %s1779_s9 = sadd.s32 4294967295, %s1700_s30   ;;  %s1700_s30 = sphi %s1764_s30, %s2129_s30   ;;  %s1696_s29 = sphi %s1762_s29, %s2131_s29   ;;  %s1692_s28 = sphi %s1760_s28, %s2133_s28   ;;  %s1688_s27 = sphi %s1758_s27, %s2132_s27  }
   0xd   : > { %s1296_s10 = sadd.s32 4294967294, %s1700_s30   ;;  %s1783_s11 = sadd.s32 1, %s1700_s30  }
   0xe   : > { %2103 = sst [smem:[#allocation17_spill]] %s1783_s11  ;;  %s35_s12 = sadd.s32 1, %s1696_s29 }
   0xf   : > { %s32_s13 = ssub.s32 %s1700_s30, %s1783_s11  ;;  %p42_p0 = scmp.ne.s32.totalorder %s1696_s29, %s1692_s28 }
  0x10   : > { %p33_p1 = scmp.eq.s32.totalorder %s32_s13, 0  ;;  %p43_p2 = scmp.eq.s32.totalorder %s1700_s30, 0 }
  0x11   : > { %p48_p3 = scmp.ne.s32.totalorder %s1692_s28, %s1688_s27  ;;  %p2090_p4 = scmp.eq.s32.totalorder %s1779_s9, 0 }
  0x12   : > { %s1795_s14 = scalar_select %p33_p1, %s1696_s29, %s35_s12  }
  0x13   : > { %p1797_p5 = por %p43_p2, %p42_p0  ;;  %p1803_p6 = por %p2090_p4, %p48_p3 }
  0x14   : > { %2104 = sst [smem:[#allocation18_spill]] %s1795_s14  ;;  %p224_p7 = scmp.eq.s32.totalorder %s1779_s9, 1 }
  0x15   : > { %s2106_s16 = scalar_select %p1803_p6, 1, 0 }
  0x16   : > { %p230_p8 = scmp.eq.s32.totalorder %s1296_s10, 1  ;;  %p1297_p9 = scmp.ge.s32.totalorder %s1700_s30, 1 }
  0x17   : > { %p237_p10 = scmp.lt.s32.totalorder %s1700_s30, 3  ;;  %p1810_p11 = por %p224_p7, %p42_p0 }
  0x18   : > { %p1814_p12 = por %p230_p8, %p48_p3  ;;  %s1702_s20 = smov [#allocation7]  }
  0x19   : > { %s2107_s17 = scalar_select %p1810_p11, 1, 0 }
  0x1a   : > { %s2108_s18 = scalar_select %p1814_p12, 1, 0 }
  0x1b   : > { %p1818_p13 = pnand %p1297_p9, %p237_p10  ;;  %s249_s21 = sshll.u32 %s1702_s20, 4  ;;  %s250_s21 = int_to_ptr.vmem [resolvable:$true] %s249_s21 }
  0x1c   : > { %2109 = sst [smem:[#allocation19_spill]] %s2108_s18  ;;  %p1462_p3 = scmp.lt.s32.totalorder %s1700_s30, 2 }
  0x1d   : > { %s2110_s19 = scalar_select %p1818_p13, 1, 0 }
  0x1e   : > { %p1442_p1 = pneg %p1818_p13  ;;  %s1703_s23 = smov [#allocation8]  }
  0x1f   : > { %s265_s24 = sshll.u32 %s1703_s23, 4  ;;  %s1527_s25 = scalar_lea.vmem %s250_s21, 1536  ;;  %s266_s24 = int_to_ptr.vmem [resolvable:$true] %s265_s24 }
  0x20   : > { %p1826_p2 = pnand %p1442_p1, %p2090_p4  ;;  %p1528_p8 = scmp.ne.s32.totalorder %s250_s21, %s1527_s25 }
  0x21   : > { %p1535_p12 = scmp.lt.s32.totalorder %s250_s21, %s250_s21  ;;  %p1536_p11 = scmp.lt.s32.totalorder %s1527_s25, %s1527_s25 }
  0x22   : > { %p1518_p7 = pneg %p1826_p2 }
  0x23   : > { %p1537_p1 = por %p1536_p11, %p1535_p12 }
  0x24   : > { %p1530_p9 = pnand %p1528_p8, %p1518_p7 }
  0x26   : > { %p1531_p10 = pneg %p1530_p9 }
  0x28   : > { %p1538_p4 = pnand %p1537_p1, %p1531_p10 }
  0x2a   : > { %1541 = shalt.err (!%p1538_p4)
}
  0x2b   : > { %s2091_s26 = smov 128   ;;  %s2092_s10 = smov 8  }
  0x2c   : > { %s2112_s2 = sld [smem:[#allocation21_spill]]  ;;  %p1849_p8 = pnand %p1462_p3, %p1797_p5 }
  0x2d   : > { %s1553_s23 = scalar_lea.vmem %s266_s24, 512  ;;  %p1561_p9 = scmp.lt.s32.totalorder %s266_s24, %s266_s24 }
  0x2e   : > { %p1554_p4 = scmp.ne.s32.totalorder %s266_s24, %s1553_s23  ;;  %p1562_p10 = scmp.lt.s32.totalorder %s1553_s23, %s1553_s23 }
  0x30   : > { %p1556_p11 = pnand %p1554_p4, %p1518_p7  ;;  %p1563_p1 = por %p1562_p10, %p1561_p9 }
  0x32   : > { %1445 = dma.hbm_to_vmem [thread:$0]  (!%p1826_p2), %s2112_s2, 1536, %s250_s21, [#allocation6], %s2091_s26, %s2091_s26, %s2092_s10  }
  0x33   : > { %p1557_p12 = pneg %p1556_p11 }
  0x35   : > { %p1564_p0 = pnand %p1563_p1, %p1557_p12 }
  0x37   : > { %1567 = shalt.err (!%p1564_p0)
}
  0x38   : > { %s2114_s4 = sld [smem:[#allocation22_spill]]  ;;  %s1865_s25 = sand.u32 1, %s1696_s29  }
  0x39   : > { %s1426_s12 = smul.u32 24, %s1865_s25  ;;  %s1301_s13 = sshll.u32 %s1700_s30, 7 }
  0x3a   : > { %s2115_s0 = sld [smem:[#allocation20_spill]] }
  0x3b   : > { %s292_s15 = scalar_lea.vmem [#allocation2], %s1426_s12 }
  0x3c   : > { %s298_s21 = sshll.u32 %s292_s15, 4  ;;  %s1875_s21 = int_to_ptr.vmem [resolvable:$true] %s298_s21 }
  0x3e   : > { %1448 = dma.hbm_to_vmem [thread:$0]  (!%p1826_p2), %s2114_s4, 512, %s266_s24, [#allocation9], %s2091_s26, %s2091_s26, %s2092_s10  }
  0x3f   : > { %s289_s24 = scalar_lea.sflag [#allocation3], %s1865_s25  ;;  %p1570_p2 = pneg %p1849_p8 }
  0x40   : > { %s1872_s2 = scalar_lea.hbm %s2115_s0, %s1301_s13  ;;  %s1573_s22 = scalar_lea.hbm %s2115_s0, 768 }
  0x41   : > { %s1568_s26 = scalar_lea.hbm %s1872_s2, 384  ;;  %p1574_p7 = scmp.lt.s32.totalorder %s1872_s2, %s2115_s0 }
  0x42   : > { %p1569_p5 = scmp.ne.s32.totalorder %s1872_s2, %s1568_s26  ;;  %p1575_p4 = scmp.lt.s32.totalorder %s1573_s22, %s1568_s26 }
  0x44   : > { %p1571_p0 = pnand %p1570_p2, %p1569_p5  ;;  %p1576_p11 = por %p1575_p4, %p1574_p7 }
  0x46   : > { %p1572_p3 = pneg %p1571_p0 }
  0x48   : > { %p1577_p12 = pnand %p1576_p11, %p1572_p3 }
  0x4a   : > { %1580 = shalt.err (!%p1577_p12)
}
  0x4b   : > { %s1581_s12 = scalar_lea.vmem %s1875_s21, 384  ;;  %s1706_s15 = smov [#allocation2]  }
  0x4c   : > { %p1582_p9 = scmp.ne.s32.totalorder %s1875_s21, %s1581_s12  ;;  %s1586_s23 = sshll.u32 %s1706_s15, 4  ;;  %s1587_s23 = int_to_ptr.vmem [resolvable:$false] %s1586_s23 }
  0x4d   : > { %s1588_s13 = scalar_lea.vmem %s1587_s23, 768  ;;  %p1589_p5 = scmp.lt.s32.totalorder %s1875_s21, %s1587_s23 }
  0x4e   : > { %p1584_p10 = pnand %p1582_p9, %p1570_p2  ;;  %p1590_p0 = scmp.lt.s32.totalorder %s1588_s13, %s1581_s12 }
  0x50   : > { %p1585_p1 = pneg %p1584_p10  ;;  %p1591_p6 = por %p1590_p0, %p1589_p5 }
  0x52   : > { %p1592_p7 = pnand %p1591_p6, %p1585_p1 }
  0x54   : > { %1595 = shalt.err (!%p1592_p7)
}
  0x55   : > { %s1707_s4 = smov 256   ;;  %s2116_s26 = smov 8  }
  0x56   : > { %s2117_s10 = smov 128   ;;  %s1302_s22 = sshll.u32 %s1865_s25, 1 }
  0x57   : > { %1452 = dma.hbm_to_vmem [thread:$0]  (!%p1849_p8), %s1872_s2, 384, %s1875_s21, %s289_s24, %s1707_s4, %s2117_s10, %s2116_s26  }
  0x58   : > { %s1303_s15 = sshll.u32 %s1700_s30, 5  ;;  %s312_s14 = scalar_lea.vmem [#allocation5], %s1302_s22 }
  0x59   : > { %s1911_s13 = scalar_lea.hbm %s2081_s1, %s1303_s15  ;;  %s319_s0 = sshll.u32 %s312_s14, 4  ;;  %s320_s0 = int_to_ptr.vmem [resolvable:$true] %s319_s0 }
  0x5a   : > { %s2118_s29 = sand.u32 1, %s1700_s30   ;;  %s1596_s18 = scalar_lea.hbm %s1911_s13, 32 }
  0x5b   : > { %s309_s11 = scalar_lea.sflag [#allocation6], %s2118_s29  ;;  %p1597_p6 = scmp.ne.s32.totalorder %s1911_s13, %s1596_s18 }
  0x5c   : > { %s1601_s21 = scalar_lea.hbm %s2081_s1, 64  ;;  %p1602_p11 = scmp.lt.s32.totalorder %s1911_s13, %s2081_s1 }
  0x5d   : > { %p1599_p3 = pnand %p1597_p6, %p1570_p2  ;;  %p1603_p12 = scmp.lt.s32.totalorder %s1601_s21, %s1596_s18 }
  0x5f   : > { %p1600_p4 = pneg %p1599_p3  ;;  %p1604_p9 = por %p1603_p12, %p1602_p11 }
  0x61   : > { %p1605_p10 = pnand %p1604_p9, %p1600_p4 }
  0x63   : > { %1608 = shalt.err (!%p1605_p10)
}
  0x64   : > { %s1609_s14 = scalar_lea.vmem %s320_s0, 32  ;;  %s1708_s29 = smov [#allocation5]  }
  0x65   : > { %p1610_p1 = scmp.ne.s32.totalorder %s320_s0, %s1609_s14  ;;  %s1614_s26 = sshll.u32 %s1708_s29, 4  ;;  %s1615_s26 = int_to_ptr.vmem [resolvable:$false] %s1614_s26 }
  0x66   : > { %s1616_s10 = scalar_lea.vmem %s1615_s26, 64  ;;  %p1617_p7 = scmp.lt.s32.totalorder %s320_s0, %s1615_s26 }
  0x67   : > { %p1612_p5 = pnand %p1610_p1, %p1570_p2  ;;  %p1618_p6 = scmp.lt.s32.totalorder %s1616_s10, %s1609_s14 }
  0x69   : > { %p1613_p0 = pneg %p1612_p5  ;;  %p1619_p3 = por %p1618_p6, %p1617_p7 }
  0x6b   : > { %p1620_p13 = pnand %p1619_p3, %p1613_p0 }
  0x6d   : > { %1623 = shalt.err (!%p1620_p13)
}
  0x6e   : > { %1455 = dma.hbm_to_vmem [thread:$0]  (!%p1849_p8), %s1911_s13, 32, %s320_s0, %s309_s11  }
  0x6f   : > { %p2119_p4 = scmp.ne.s32.totalorder %s2110_s19, 0 }
  0x70   : > { %s1936_s18 = sand.u32 (!%p2119_p4), 1, %s1692_s28   ;;  %p2120_p2 = scmp.ne.s32.totalorder (!%p2119_p4), %s2106_s16, 0 }
  0x71   : > { %328 = sbr.rel (%p2119_p4) target bundleno = 1520 (0x5f0), region = 52  ;;  %s331_s15 = scalar_lea.sflag (!%p2119_p4), [#allocation3], %s1936_s18 }
  0x72   : > { %s1427_s22 = smul.u32 (!%p2119_p4), 24, %s1936_s18 }
  0x74   : > { %s1940_s12 = scalar_lea.vmem (!%p2119_p4), [#allocation2], %s1427_s22 }
  0x76   : > { %1667 = dma.done.wait (%p2120_p2), %s331_s15, 384  }
  0x77   : > { %1669 = vsyncadd (%p2120_p2), %s331_s15, 4294966912  ;;  %s339_s0 = sand.u32 1, %s1779_s9   ;;  %s1305_s11 = sshll.u32 %s1936_s18, 1 }
  0x78   : > { %s340_s19 = scalar_lea.sflag [#allocation6], %s339_s0  ;;  %s1948_s20 = scalar_lea.vmem [#allocation5], %s1305_s11 }
  0x79   : > { %1671 = dma.done.wait (%p2120_p2), %s340_s19, 32  }
  0x7a   : > { %1673 = vsyncadd (%p2120_p2), %s340_s19, 4294967264  ;;  %p2121_p13 = scmp.eq.s32.totalorder %s1779_s9, 0 }
  0x7c   : > { %1675 = dma.done.wait (%p2121_p13), [#allocation6], 1536   ;;  %p2122_p8 = pmov %p2121_p13 }
  0x7e   : > { %1677 = vsyncadd (%p2122_p8), [#allocation6], 4294965760  ;;  %p2123_p11 = pmov %p2122_p8 }
  0x7f   : > { %p2124_p12 = pmov %p2122_p8 }
  0x80   : > { %1679 = dma.done.wait (%p2123_p11), [#allocation9], 512  }
  0x81   : > { %1681 = vsyncadd (%p2124_p12), [#allocation9], 4294966784  ;;  %v1709_v0 = vmov 0.0   ;;  %vm1710_vm0 = vmmov 0   ;;  %v399_v1 = vld [vmem:[#allocation7 + $0x38] sm:$0xff]  ;;  %v398_v3 = vld [vmem:[#allocation7 + $0x30] sm:$0xff] }
  0x82   : > { %1370 = vmatprep.subr.mxu1 %v1709_v0  ;;  %1359 = vmatprep.subr.mxu0 %v1709_v0  ;;  %v395_v2 = vld [vmem:[#allocation7 + $0x18] sm:$0xff]  ;;  %v394_v4 = vld [vmem:[#allocation7 + $0x10] sm:$0xff]  ;;  %v397_v5 = vld [vmem:[#allocation7 + $0x28] sm:$0xff]  ;;  %vm425_vm1 = vcmask 261120   ;;  %vm655_vm2 = vcmask 130048   ;;  %s1711_s25 = smov 112  }
  0x83   : > { %1378 = vmatprep.mubr.msk.f32.mxu1 %vm1710_vm0, %v1709_v0  ;;  %1367 = vmatprep.mubr.msk.f32.mxu0 %vm1710_vm0, %v1709_v0  ;;  %v393_v6 = vld [vmem:[#allocation7 + $0x8] sm:$0xff]  ;;  %v396_v7 = vld [vmem:[#allocation7 + $0x20] sm:$0xff]  ;;  %v403_v11 = vld [vmem:[#allocation7 + $0x58] sm:$0xff]  ;;  %vm810_vm3 = vcmask 64512   ;;  %s1308_s29 = sshll.u32 %s1936_s18, 3  ;;  %s1171_s23 = scalar_lea.sflag [#allocation4], %s1936_s18 }
  0x84   : > { %1371 = vmatpush3.msra.mxu1 %v399_v1  ;;  %1360 = vmatpush3.msra.mxu0 %v395_v2  ;;  %v392_v8 = vld [vmem:[#allocation7] sm:$0xff]  ;;  %v390_v9 = vld [vmem:[%s1940_s12 + $0x8] sm:$0xff]  ;;  %v804_v26 = vld [vmem:[%s1948_s20] sm:$0x3]  ;;  %s388_s0 = scalar_lea.vmem [#allocation10], %s1308_s29  ;;  %p2125_p10 = scmp.ne.s32.totalorder %s2107_s17, 0 }
  0x85   : > { %1372 = vmatprep.subr.mxu1 %v1709_v0  ;;  %1361 = vmatprep.subr.mxu0 %v1709_v0  ;;  %v1974_v10 = vld [vmem:[%s1940_s12] sm:$0xff]  ;;  %v391_v17 = vld [vmem:[%s1940_s12 + $0x10] sm:$0xff]  ;;  %v805_v27 = vunpack.c.0.s8 %v804_v26  ;;  %s1327_s12 = sshll.u32 %s1779_s9, 7  ;;  %s1184_s11 = sshll.u32 %s388_s0, 4  ;;  %s1185_s11 = int_to_ptr.vmem [resolvable:$true] %s1184_s11 }
  0x86   : > { %1373 = vmatpush3.msra.mxu1 %v398_v3  ;;  %1362 = vmatpush3.msra.mxu0 %v394_v4  ;;  %v402_v12 = vld [vmem:[#allocation7 + $0x50] sm:$0xff]  ;;  %v401_v13 = vld [vmem:[#allocation7 + $0x48] sm:$0xff]  ;;  %v400_v15 = vld [vmem:[#allocation7 + $0x40] sm:$0xff]  ;;  %s1182_s16 = scalar_lea.hbm %s2088_s8, %s1327_s12  ;;  %s1624_s13 = scalar_lea.vmem %s1185_s11, 128 }
  0x87   : > { %1374 = vmatprep.subr.mxu1 %v1709_v0  ;;  %1363 = vmatprep.subr.mxu0 %v1709_v0  ;;  %v1310_v14 = vld [vmem:[%s2083_s3 + $0x1] ss:$0 sm:$0xff]  ;;  %v1309_v16 = vld [vmem:[%s2083_s3] ss:$0 sm:$0xff]  ;;  %v806_v28 = vcvt.s32.f32 %v805_v27  ;;  %v1311_v34 = vld [vmem:[%s2083_s3 + $0x2] ss:$0 sm:$0xff]  ;;  %p1625_p9 = scmp.ne.s32.totalorder %s1185_s11, %s1624_s13 }
  0x88   : > { %1375 = vmatpush3.msra.mxu1 %v397_v5  ;;  %1364 = vmatpush3.msra.mxu0 %v393_v6  ;;  %v980_v51 = vld [vmem:[#allocation8 + $0x8] sm:$0xff]  ;;  %v979_v54 = vld [vmem:[#allocation8] sm:$0xff]  ;;  %v982_v55 = vld [vmem:[#allocation8 + $0x18] sm:$0xff]  ;;  %s1712_s2 = smov [#allocation10]  }
  0x89   : > { %1376 = vmatprep.subr.mxu1 %v1709_v0  ;;  %1365 = vmatprep.subr.mxu0 %v1709_v0  ;;  %v807_v29 = vmul.f32 -1e+30, %v806_v28  ;;  %v981_v57 = vld [vmem:[#allocation8 + $0x10] sm:$0xff]  ;;  %v1323_v6 = vld [vmem:[%s2085_s5] ss:$0 sm:$0xff]  ;;  %p1626_p1 = pnand %p1625_p9, %p2125_p10 }
  0x8a   : > { %1377 = vmatpush3.msra.mxu1 %v396_v7  ;;  %1366 = vmatpush3.msra.mxu0 %v392_v8 }
  0x8b   : > { %1379 = vmatmul.mubr.msk.f32.vlgmr.msra.gmra.mxu1 %vm425_vm1, %v390_v9  ;;  %1368 = vmatmul.mubr.msk.f32.vlgmr.msra.gmra.mxu0 %vm425_vm1, %v1974_v10  ;;  %p1627_p5 = pneg %p1626_p1 }
  0x8c   : > { %1392 = vmatprep.subr.mxu1 %v1709_v0  ;;  %1394 = vmatprep.mubr.msk.f32.mxu1 %vm1710_vm0, %v1709_v0 }
  0x8d   : > { %1381 = vmatprep.subr.mxu0 %v1709_v0  ;;  %1389 = vmatprep.mubr.msk.f32.mxu0 %vm1710_vm0, %v1709_v0 }
  0x8e   : > { %1382 = vmatpush3.msra.mxu0 %v403_v11 }
  0x8f   : > { %1383 = vmatprep.subr.mxu0 %v1709_v0 }
  0x90   : > { %1384 = vmatpush3.msra.mxu0 %v402_v12 }
  0x91   : > { %1385 = vmatprep.subr.mxu0 %v1709_v0 }
  0x92   : > { %1386 = vmatpush3.msra.mxu0 %v401_v13 }
  0x93   : > { %1387 = vmatprep.subr.mxu0 %v1709_v0 }
  0x94   : > { %1388 = vmatpush3.msra.mxu0 %v400_v15 }
  0x95   : > { %1390 = vmatmul.mubr.msk.f32.vlgmr.msra.gmra.mxu0 %vm425_vm1, %v391_v17  ;;  %1402 = vmatprep.subr.mxu0 %v1709_v0 }
  0x96   : > { %1404 = vmatprep.mubr.msk.f32.mxu0 %vm1710_vm0, %v1709_v0 }
 0x14b   : > { %v568_v18 = vpop.f32.mrf.mxu1  ;;  %v495_v19 = vpop.f32.mrf.mxu0 }
 0x14c   : > { %v569_v20 = vadd.f32 %v1310_v14, %v568_v18  ;;  %v496_v21 = vadd.f32 %v1309_v16, %v495_v19 }
 0x14d   : > { %v1380_v22 = vpop.f32.mrf.mxu1  ;;  %v1369_v23 = vpop.f32.mrf.mxu0 }
 0x14e   : > { %649 = vrot.lane.b32.xlu0 %v569_v20, %s1711_s25  ;;  %1393 = vmatpush3.xpose.msk.msra.mxu1 %vm655_vm2, %v569_v20  ;;  %v1325_v23 = vld [vmem:[%s2087_s7] ss:$0 sm:$0xff] }
 0x14f   : > { %1397 = vmatprep.subr.mxu1 %v1709_v0 }
 0x151   : > { %1395 = vmatmul.mubr.msk.f32.vlgmr.msra.gmra.mxu1 %vm655_vm2, %v496_v21 }
 0x152   : > { %646 = vrot.lane.b32.xlu0 %v496_v21, %s1711_s25  ;;  %1399 = vmatprep.mubr.msk.f32.mxu1 %vm1710_vm0, %v1709_v0 }
 0x155   : > { %v641_v35 = vpop.f32.mrf.mxu0 }
 0x156   : > { %v642_v36 = vadd.f32 %v1311_v34, %v641_v35 }
 0x157   : > { %v1391_v37 = vpop.f32.mrf.mxu0 }
 0x158   : > { %652 = vrot.lane.b32.xlu0 %v642_v36, %s1711_s25  ;;  %1403 = vmatpush3.msra.mxu0 %v642_v36  ;;  %s1628_s25 = sshll.u32 %s1712_s2, 4  ;;  %s1629_s25 = int_to_ptr.vmem [resolvable:$false] %s1628_s25 }
 0x159   : > { %1412 = vmatprep.subr.mxu0 %v1709_v0  ;;  %s1630_s9 = scalar_lea.vmem %s1629_s25, 256  ;;  %p1631_p0 = scmp.lt.s32.totalorder %s1185_s11, %s1629_s25 }
 0x15a   : > { %p1632_p7 = scmp.lt.s32.totalorder %s1630_s9, %s1624_s13 }
 0x15c   : > { %p1633_p6 = por %p1632_p7, %p1631_p0 }
 0x15e   : > { %p1634_p3 = pnand %p1633_p6, %p1627_p5 }
 0x1c0   : > { %v650_v24 = vpop.permute.xlu0 %649 }
 0x1c1   : > { %1398 = vmatpush3.xpose.msk.msra.mxu1 %vm655_vm2, %v650_v24 }
 0x1c2   : > { %1407 = vmatprep.subr.mxu1 %v1709_v0 }
 0x1c4   : > { %v647_v25 = vpop.permute.xlu0 %646 }
 0x1c5   : > { %1400 = vmatmul.mubr.msk.f32.vlgmr.msra.gmra.mxu1 %vm655_vm2, %v647_v25 }
 0x1c6   : > { %1409 = vmatprep.mubr.msk.f32.mxu1 %vm1710_vm0, %v1709_v0 }
 0x1ca   : > { %v653_v42 = vpop.permute.xlu0 %652 }
 0x1cb   : > { %1408 = vmatpush3.msra.mxu1 %v653_v42 }
 0x1cc   : > { %1419 = vmatprep.subr.mxu1 %v1709_v0 }
 0x211   : > { %v726_v30 = vpop.f32.mrf.mxu1 }
 0x212   : > { %v808_v31 = vadd.f32 %v807_v29, %v726_v30 }
 0x213   : > { %v1396_v32 = vpop.f32.mrf.mxu1 }
 0x214   : > { %v811_v33 = vsel %vm810_vm3, %v808_v31, -inf }
 0x215   : > { %812 = vmax.xlane.f32.xlu1 %v811_v33 }
 0x285   : > { %v800_v38 = vpop.f32.mrf.mxu1 }
 0x286   : > { %v809_v39 = vadd.f32 %v807_v29, %v800_v38 }
 0x287   : > { %v1401_v40 = vpop.f32.mrf.mxu1 }
 0x288   : > { %v814_v41 = vsel %vm810_vm3, %v809_v39, -inf }
 0x289   : > { %815 = vmax.xlane.f32.xlu1 %v814_v41 }
 0x29e   : > { %v813_v43 = vpop.xlane.xlu1 %812 }
 0x29f   : > { %v817_v44 = vsub.f32 %v808_v31, %v813_v43 }
 0x2a1   : > { %v819_v45 = vmul.f32 1.442695, %v817_v44 }
 0x2a3   : > { %1506 = vpow2.f32 %v819_v45 }
 0x2b0   : > { %v1507_v46 = vpop.eup %1506 }
 0x2b1   : > { %1405 = vmatmul.mubr.msk.f32.vlgmr.msra.gmra.mxu0 %vm810_vm3, %v1507_v46  ;;  %v823_v47 = vsel %vm810_vm3, %v1507_v46, 0.0 }
 0x2b2   : > { %824 = vadd.xlane.f32.xlu1 %v823_v47  ;;  %1416 = vmatprep.mubr.msk.f32.mxu0 %vm1710_vm0, %v1709_v0 }
 0x2b3   : > { %1413 = vmatpush3.msra.mxu0 %v982_v55 }
 0x2b4   : > { %1414 = vmatprep.subr.mxu0 %v1709_v0 }
 0x2b5   : > { %1415 = vmatpush3.msra.mxu0 %v981_v57 }
 0x312   : > { %v816_v48 = vpop.xlane.xlu1 %815 }
 0x313   : > { %v818_v49 = vsub.f32 %v809_v39, %v816_v48 }
 0x315   : > { %v821_v50 = vmul.f32 1.442695, %v818_v49 }
 0x317   : > { %1508 = vpow2.f32 %v821_v50 }
 0x324   : > { %v1509_v52 = vpop.eup %1508 }
 0x325   : > { %1410 = vmatmul.mubr.msk.f32.vlgmr.msra.gmra.mxu1 %vm810_vm3, %v1509_v52  ;;  %v826_v53 = vsel %vm810_vm3, %v1509_v52, 0.0 }
 0x326   : > { %827 = vadd.xlane.f32.xlu0 %v826_v53  ;;  %1420 = vmatpush3.msra.mxu1 %v980_v51 }
 0x327   : > { %1421 = vmatprep.subr.mxu1 %v1709_v0  ;;  %1423 = vmatprep.mubr.msk.f32.mxu1 %vm1710_vm0, %v1709_v0 }
 0x328   : > { %1422 = vmatpush3.msra.mxu1 %v979_v54 }
 0x33b   : > { %v825_v56 = vpop.xlane.xlu1 %824 }
 0x33c   : > { %1510 = vrcp.f32 %v825_v56 }
 0x349   : > { %v1511_v58 = vpop.eup %1510 }
 0x371   : > { %v898_v59 = vpop.f32.mrf.mxu0 }
 0x372   : > { %v977_v60 = vmul.f32 %v1511_v58, %v898_v59 }
 0x373   : > { %v1406_v61 = vpop.f32.mrf.mxu0 }
 0x374   : > { %1424 = vmatmul.mubr.msk.f32.vlgmr.msra.gmra.mxu1 %vm655_vm2, %v977_v60 }
 0x3af   : > { %v828_v62 = vpop.xlane.xlu0 %827 }
 0x3b0   : > { %1512 = vrcp.f32 %v828_v62 }
 0x3bd   : > { %v1513_v63 = vpop.eup %1512 }
 0x3e5   : > { %v971_v1 = vpop.f32.mrf.mxu1 }
 0x3e6   : > { %v978_v2 = vmul.f32 %v1513_v63, %v971_v1 }
 0x3e7   : > { %v1411_v3 = vpop.f32.mrf.mxu1 }
 0x3e8   : > { %1417 = vmatmul.mubr.msk.f32.vlgmr.msra.gmra.mxu0 %vm655_vm2, %v978_v2 }
 0x434   : > { %v1125_v4 = vpop.f32.mrf.mxu1 }
 0x436   : > { %v1425_v0 = vpop.f32.mrf.mxu1 }
 0x4a8   : > { %v1052_v5 = vpop.f32.mrf.mxu0 }
 0x4a9   : > { %v1126_v7 = vadd.f32 %v1125_v4, %v1052_v5 }
 0x4aa   : > { %v1418_v8 = vpop.f32.mrf.mxu0 }
 0x4ab   : > { %v1136_v9 = vadd.f32 %v1323_v6, %v1126_v7 }
 0x4ad   : > { %v1138_v11 = vadd.f32 %v1136_v9, %v1974_v10  ;;  %v1324_v10 = vld [vmem:[%s2086_s6] ss:$0 sm:$0xff] }
 0x4af   : > { %v1139_v12 = vsel %vm425_vm1, %v1138_v11, 0.0 }
 0x4b0   : > { %1140 = vadd.xlane.f32.xlu1 %v1139_v12 }
 0x539   : > { %v1141_v13 = vpop.xlane.xlu1 %1140 }
 0x53a   : > { %v1143_v14 = vmul.f32 0.03125, %v1141_v13 }
 0x53c   : > { %v1144_v15 = vsub.f32 %v1138_v11, %v1143_v14 }
 0x53e   : > { %v1145_v16 = vmul.f32 %v1144_v15, %v1144_v15 }
 0x540   : > { %v1146_v17 = vsel %vm425_vm1, %v1145_v16, 0.0 }
 0x541   : > { %1147 = vadd.xlane.f32.xlu1 %v1146_v17 }
 0x5ca   : > { %v1148_v18 = vpop.xlane.xlu1 %1147 }
 0x5cb   : > { %v1149_v19 = vmul.f32 0.03125, %v1148_v18 }
 0x5cd   : > { %v1150_v20 = vadd.f32 1e-05, %v1149_v19 }
 0x5cf   : > { %1514 = vrsqrt.f32 %v1150_v20 }
 0x5dc   : > { %v1515_v21 = vpop.eup %1514 }
 0x5dd   : > { %v1152_v22 = vmul.f32 %v1515_v21, %v1144_v15 }
 0x5df   : > { %v1160_v24 = vmul.f32 %v1324_v10, %v1152_v22 }
 0x5e1   : > { %v1168_v25 = vadd.f32 %v1325_v23, %v1160_v24 }
 0x5e3   : > { %1169 = vst.msk [vmem:[%s388_s0] sm:$0xff] %vm425_vm1, %v1168_v25 }
 0x5e4   : > { %1637 = shalt.err (!%p1634_p3)
}
 0x5e5   : > { %s1638_s21 = scalar_lea.hbm %s1182_s16, 128  ;;  %s1642_s4 = scalar_lea.hbm %s2088_s8, 256 }
 0x5e6   : > { %p1639_p4 = scmp.ne.s32.totalorder %s1182_s16, %s1638_s21  ;;  %p1643_p8 = scmp.lt.s32.totalorder %s1182_s16, %s2088_s8 }
 0x5e7   : > { %p1644_p11 = scmp.lt.s32.totalorder %s1642_s4, %s1638_s21 }
 0x5e8   : > { %p1640_p2 = pnand %p1639_p4, %p2125_p10 }
 0x5e9   : > { %p1645_p12 = por %p1644_p11, %p1643_p8 }
 0x5ea   : > { %p1641_p13 = pneg %p1640_p2 }
 0x5ec   : > { %p1646_p9 = pnand %p1645_p12, %p1641_p13 }
 0x5ee   : > { %1649 = shalt.err (!%p1646_p9)
}
 0x5ef   : > { %1440 = dma.vmem_to_hbm [thread:$0]  (%p2125_p10), %s1185_s11, 128, %s1182_s16, %s1171_s23  }
 0x5f0 PF: > { %s2126_s26 = sld [smem:[#allocation19_spill]]  ;;  %s1196_s10 = sand.u32 1, %s1688_s27  }
 0x5f1   : > { %p2128_p5 = scmp.ge.s32.totalorder %s1700_s30, 2  ;;  %s1197_s22 = scalar_lea.sflag [#allocation4], %s1196_s10 }
 0x5f6   : > { %p2127_p1 = scmp.ne.s32.totalorder %s2126_s26, 0 }
 0x5f8   : > { %p1457_p0 = pnand %p2128_p5, %p2127_p1 }
 0x5fa   : > { %p1458_p7 = pneg %p1457_p0 }
 0x5fc   : > { %1683 = dma.done.wait (%p1458_p7), %s1197_s22, 128  }
 0x5fd   : > { %1685 = vsyncadd (%p1458_p7), %s1197_s22, 4294967168  ;;  %s2129_s30 = sld [smem:[#allocation17_spill]]  ;;  %s2132_s27 = smov %s1692_s28 }
 0x5fe   : > { %s2130_s15 = sld [smem:[#allocation16_spill]] }
 0x5ff   : > { %s2131_s29 = sld [smem:[#allocation18_spill]] }
 0x603   : > { %p25_p6 = scmp.ge.s32.totalorder %s2129_s30, 4  }
 0x604   : > { %s2133_s28 = smov %s2130_s15 }
 0x605   :  { %27 = sbr.rel (!%p25_p6) target bundleno = 12 (0xc), region = 118 }
 0x60a   :  { %1202 = vsyncpa [#allocation3], 1 }
 0x60b   :  { %1204 = vsyncpa [#allocation3 + $0x1], 1 }
 0x60c   :  { %1205 = vsyncpa [#allocation6], 1 }
 0x60d   :  { %1207 = vsyncpa [#allocation6 + $0x1], 1 }
 0x60e   :  { %1208 = vsyncpa [#allocation9], 1 }
 0x60f   :  { %1209 = vsyncpa [#allocation4], 1 }
 0x610   :  { %1211 = vsyncpa [#allocation4 + $0x1], 1 }

</bundles_post_ra>
